<compile_context>
chip_gen: v5e
topology: v5e:2x2
jax: 0.10.0
libtpu: 0.0.40
codegen_flags: <defaults>
</compile_context>

<pallas_src>
import functools

import jax
import jax.numpy as jnp
from jax.experimental import pallas as pl
from jax.experimental.pallas import tpu as pltpu

_INV_SQRT2 = 0.7071067811865476


def _conv1_gelu_tile(x_ref, xp_ref, xn_ref, w1_ref, b1_ref, *, tn, pad):
    """Depthwise conv1 (+bias) + exact GELU for one (tn, C) tile.

    Returns y1 of shape (tn + 2*pad, C) covering sequence positions
    [nt*tn - pad, nt*tn + tn + pad); the +/- pad rows are the halo conv2 needs.
    Global out-of-range positions are built from zero-masked halos, so they
    reproduce Conv1d's zero padding exactly.
    """
    H = 2 * pad
    nt = pl.program_id(1)
    n_tiles = pl.num_programs(1)

    x_c = x_ref[0].astype(jnp.float32)                    # (tn, C) current tile
    prev = xp_ref[0, 8 - H:8, :].astype(jnp.float32)      # (H, C) tail of prev 8-row block
    nxt = xn_ref[0, 0:H, :].astype(jnp.float32)           # (H, C) head of next 8-row block
    # Zero the halos at the sequence edges (index_map clamps, so mask here).
    prev = prev * jnp.where(nt == 0, 0.0, 1.0).astype(jnp.float32)
    nxt = nxt * jnp.where(nt == n_tiles - 1, 0.0, 1.0).astype(jnp.float32)

    window = jnp.concatenate([prev, x_c, nxt], axis=0)    # (tn + 2H, C)

    w1 = w1_ref[...].astype(jnp.float32)                  # (K, C)
    b1 = b1_ref[...].astype(jnp.float32)                  # (1, C)
    k_taps = w1_ref.shape[0]
    m = tn + 2 * pad
    acc = window[0:m, :] * w1[0:1, :] + b1                # bias fused into tap 0
    for k in range(1, k_taps):                            # static unroll (K taps)
        acc = acc + window[k:k + m, :] * w1[k:k + 1, :]

    # nn.GELU() default = exact erf GELU (tanh approx would use the EUP slot
    # but changes numerics; keep parity).
    return 0.5 * acc * (1.0 + jax.lax.erf(acc * jnp.float32(_INV_SQRT2)))


def _stats_kernel(x_ref, xp_ref, xn_ref, w1_ref, b1_ref, sum_ref, ssq_ref,
                  *, tn, pad):
    """Sweep 1: per-tile partial sum / sum-of-squares of conv1+GELU (one pass)."""
    y1 = _conv1_gelu_tile(x_ref, xp_ref, xn_ref, w1_ref, b1_ref, tn=tn, pad=pad)
    yc = y1[pad:pad + tn, :]                              # only this tile's rows
    sum_ref[0, 0] = jnp.sum(yc, axis=0, keepdims=True)
    ssq_ref[0, 0] = jnp.sum(yc * yc, axis=0, keepdims=True)


def _apply_kernel(x_ref, xp_ref, xn_ref, w1_ref, b1_ref, scale_ref, shift_ref,
                  w2_ref, b2_ref, o_ref, *, tn, pad, seq_len):
    """Sweep 2: recompute conv1+GELU, folded BN affine, conv2, store."""
    y1 = _conv1_gelu_tile(x_ref, xp_ref, xn_ref, w1_ref, b1_ref, tn=tn, pad=pad)

    yn = y1 * scale_ref[...].astype(jnp.float32) + shift_ref[...].astype(jnp.float32)

    # Zero halo rows whose global position is out of range so conv2 sees
    # Conv1d-style zero padding at the sequence ends.
    m = tn + 2 * pad
    nt = pl.program_id(1)
    pos = jax.lax.broadcasted_iota(jnp.int32, (m, 1), 0) + (nt * tn - pad)
    yn = yn * ((pos >= 0) & (pos < seq_len)).astype(jnp.float32)

    w2 = w2_ref[...].astype(jnp.float32)                  # (K, C)
    b2 = b2_ref[...].astype(jnp.float32)                  # (1, C)
    acc = yn[0:tn, :] * w2[0:1, :] + b2                   # bias fused into tap 0
    for k in range(1, w2_ref.shape[0]):
        acc = acc + yn[k:k + tn, :] * w2[k:k + 1, :]
    o_ref[0] = acc.astype(o_ref.dtype)


def dwconv_forward(x, params, L=None, *, kernel_size=5, eps=1e-5, tn=None,
                   lane_multiple=128):
    """x: (B, N, C).  `L` accepted (like the torch forward) but unused."""
    del L
    B, N, C = x.shape
    w1, b1, gamma, beta, w2, b2 = params
    pad = kernel_size // 2
    assert kernel_size % 2 == 1 and 2 * pad <= 8, "halo must fit one 8-row block"

    # Lane density: pad channels to a multiple of 128 (unmasked vst). Padded
    # channels are exactly zero through every stage and sliced off at the end.
    cp = -(-C // lane_multiple) * lane_multiple
    if cp != C:
        pad_c = lambda a: jnp.pad(a, [(0, 0)] * (a.ndim - 1) + [(0, cp - C)])
        x, w1, b1, gamma, beta, w2, b2 = map(pad_c, (x, w1, b1, gamma, beta, w2, b2))

    # N tiling (sublane axis). tn multiple of 8 so halos are whole 8-row blocks.
    if tn is None:
        cands = [t for t in range(8, min(N, 512) + 1, 8) if N % t == 0]
        assert cands, f"sequence length {N} must be a multiple of 8"
        tn = cands[-1]
    assert tn % 8 == 0 and N % tn == 0, (tn, N)
    n_tiles = N // tn
    r8 = tn // 8
    n8 = N // 8

    # x viewed three ways: the tile itself plus the 8-row blocks just before /
    # after it (clamped at the edges; masked to zero inside the kernel).
    # TODO(synk): on v7x consider pipeline_mode=pl.Buffered(3) for x_tile.
    x_tile = pl.BlockSpec((1, tn, cp), lambda b, n: (b, n, 0))
    x_prev = pl.BlockSpec((1, 8, cp), lambda b, n: (b, jnp.maximum(n * r8 - 1, 0), 0))
    x_next = pl.BlockSpec((1, 8, cp), lambda b, n: (b, jnp.minimum((n + 1) * r8, n8 - 1), 0))

    def const_spec(shape):
        zeros = (0,) * len(shape)
        return pl.BlockSpec(shape, lambda b, n: zeros)

    cparams = pltpu.CompilerParams(
        # Both grid axes independent -> shards across v7x's 2 TensorCores;
        # harmless on 1-TC v5e/v6e.
        dimension_semantics=("parallel", "parallel"),
        # Explicit budget (fits v7x's smaller scoped VMEM): double-buffered
        # (1, tn, cp) in/out + two 8-row halos + params is far below this.
        vmem_limit_bytes=32 * 1024 * 1024,
    )

    # ---- sweep 1: partial BN statistics per tile (single traversal of y1).
    part_shape = jax.ShapeDtypeStruct((B, n_tiles, 1, cp), jnp.float32)
    part_spec = lambda: pl.BlockSpec((1, 1, 1, cp), lambda b, n: (b, n, 0, 0))
    psum, pssq = pl.pallas_call(
        functools.partial(_stats_kernel, tn=tn, pad=pad),
        grid=(B, n_tiles),
        in_specs=[x_tile, x_prev, x_next,
                  const_spec((kernel_size, cp)), const_spec((1, cp))],
        out_specs=[part_spec(), part_spec()],
        out_shape=[part_shape, part_shape],
        compiler_params=cparams,
    )(x, x, x, w1, b1)

    # ---- tiny final reduction + BN fold, hoisted out of the kernels.
    cnt = jnp.float32(B * N)
    mean = jnp.sum(psum, axis=(0, 1)) / cnt                   # (1, cp)
    var = jnp.sum(pssq, axis=(0, 1)) / cnt - mean * mean      # biased (training BN)
    inv = jax.lax.rsqrt(var + jnp.float32(eps))
    scale = gamma.astype(jnp.float32) * inv                   # (1, cp)
    shift = beta.astype(jnp.float32) - mean * scale           # (1, cp)

    # ---- sweep 2: recompute conv1+GELU, normalize, conv2, store.
    out = pl.pallas_call(
        functools.partial(_apply_kernel, tn=tn, pad=pad, seq_len=N),
        grid=(B, n_tiles),
        in_specs=[x_tile, x_prev, x_next,
                  const_spec((kernel_size, cp)), const_spec((1, cp)),
                  const_spec((1, cp)), const_spec((1, cp)),
                  const_spec((kernel_size, cp)), const_spec((1, cp))],
        out_specs=pl.BlockSpec((1, tn, cp), lambda b, n: (b, n, 0)),
        out_shape=jax.ShapeDtypeStruct((B, N, cp), x.dtype),
        compiler_params=cparams,
    )(x, x, x, w1, b1, scale, shift, w2, b2)

    return out if cp == C else out[..., :C]


if __name__ == "__main__":
    B, N, C, K = 2, 16, 32, 5

    key = jax.random.PRNGKey(0)
    ks = jax.random.split(key, 5)
    x = jax.random.normal(ks[0], (B, N, C), dtype=jnp.float32)

    # PyTorch Conv1d default init: U(-1/sqrt(fan_in), 1/sqrt(fan_in)),
    # depthwise fan_in = (in_channels/groups) * K = K.
    bound = 1.0 / (K ** 0.5)
    w1 = jax.random.uniform(ks[1], (K, C), jnp.float32, -bound, bound)
    b1 = jax.random.uniform(ks[2], (1, C), jnp.float32, -bound, bound)
    w2 = jax.random.uniform(ks[3], (K, C), jnp.float32, -bound, bound)
    b2 = jax.random.uniform(ks[4], (1, C), jnp.float32, -bound, bound)
    gamma = jnp.ones((1, C), jnp.float32)   # BatchNorm1d default weight
    beta = jnp.zeros((1, C), jnp.float32)   # BatchNorm1d default bias

    params = (w1, b1, gamma, beta, w2, b2)
    out = dwconv_forward(x, params, L=N, kernel_size=K, tn=8)  # tn=8 -> 2 N-tiles (halo path)
    out = jax.block_until_ready(out)

    # Pure-JAX reference for sanity.
    def ref(x):
        pad = K // 2

        def dw(z, w, b):
            zp = jnp.pad(z, ((0, 0), (pad, pad), (0, 0)))
            acc = sum(zp[:, k:k + N, :] * w[k][None, None, :] for k in range(K))
            return acc + b[0][None, None, :]

        y = dw(x, w1, b1)
        y = 0.5 * y * (1.0 + jax.lax.erf(y / jnp.sqrt(2.0)))
        m = jnp.mean(y, axis=(0, 1), keepdims=True)
        v = jnp.mean((y - m) ** 2, axis=(0, 1), keepdims=True)
        y = (y - m) / jnp.sqrt(v + 1e-5) * gamma[0] + beta[0]
        return dw(y, w2, b2)

    r = ref(x)
    assert out.shape == (B, N, C)
    err = float(jnp.max(jnp.abs(out - r)))
    assert jnp.allclose(out, r, atol=1e-4, rtol=1e-4), err
    print("KERNEL_OK")
</pallas_src>

<mosaic_0001>
module attributes {stable_mosaic.version = 11 : i64} {
  func.func @_stats_kernel(%arg0: i32, %arg1: i32, %arg2: memref<1x8x128xf32, #tpu.memory_space<vmem>>, %arg3: memref<1x8x128xf32, #tpu.memory_space<vmem>>, %arg4: memref<1x8x128xf32, #tpu.memory_space<vmem>>, %arg5: memref<5x128xf32, #tpu.memory_space<vmem>>, %arg6: memref<1x128xf32, #tpu.memory_space<vmem>>, %arg7: memref<1x1x1x128xf32, #tpu.memory_space<vmem>>, %arg8: memref<1x1x1x128xf32, #tpu.memory_space<vmem>>) attributes {dimension_semantics = [#tpu.dimension_semantics<parallel>, #tpu.dimension_semantics<parallel>], iteration_bounds = array<i64: 2, 2>, scalar_prefetch = 0 : i64, scratch_operands = 0 : i64, tpu.core_type = #tpu.core_type<tc>, window_params = [{transform_indices = @transform_0, window_bounds = array<i64: 1, 8, 128>}, {transform_indices = @transform_1, window_bounds = array<i64: 1, 8, 128>}, {transform_indices = @transform_2, window_bounds = array<i64: 1, 8, 128>}, {pipeline_mode = #tpu.pipeline_mode<synchronous>, transform_indices = @transform_3, window_bounds = array<i64: 5, 128>}, {pipeline_mode = #tpu.pipeline_mode<synchronous>, transform_indices = @transform_4, window_bounds = array<i64: 1, 128>}, {transform_indices = @transform_5, window_bounds = array<i64: 1, 1, 1, 128>}, {transform_indices = @transform_6, window_bounds = array<i64: 1, 1, 1, 128>}]} {
    %c0 = arith.constant 0 : index
    %c0_0 = arith.constant 0 : index
    %c0_1 = arith.constant 0 : index
    %0 = vector.load %arg2[%c0, %c0_0, %c0_1] : memref<1x8x128xf32, #tpu.memory_space<vmem>>, vector<1x8x128xf32>
    %1 = vector.shape_cast %0 : vector<1x8x128xf32> to vector<8x128xf32>
    %c0_2 = arith.constant 0 : index
    %c4 = arith.constant 4 : index
    %c0_3 = arith.constant 0 : index
    %2 = vector.load %arg3[%c0_2, %c4, %c0_3] : memref<1x8x128xf32, #tpu.memory_space<vmem>>, vector<1x4x128xf32>
    %3 = vector.shape_cast %2 : vector<1x4x128xf32> to vector<4x128xf32>
    %c0_4 = arith.constant 0 : index
    %c0_5 = arith.constant 0 : index
    %c0_6 = arith.constant 0 : index
    %4 = vector.load %arg4[%c0_4, %c0_5, %c0_6] : memref<1x8x128xf32, #tpu.memory_space<vmem>>, vector<1x4x128xf32>
    %5 = vector.shape_cast %4 : vector<1x4x128xf32> to vector<4x128xf32>
    %c0_i32 = arith.constant 0 : i32
    %6 = arith.cmpi eq, %arg1, %c0_i32 : i32
    %cst = arith.constant 0.000000e+00 : f32
    %cst_7 = arith.constant 1.000000e+00 : f32
    %7 = arith.select %6, %cst, %cst_7 : f32
    %8 = vector.broadcast %7 : f32 to vector<4x128xf32>
    %9 = arith.mulf %3, %8 : vector<4x128xf32>
    %c1_i32 = arith.constant 1 : i32
    %10 = arith.cmpi eq, %arg1, %c1_i32 : i32
    %cst_8 = arith.constant 0.000000e+00 : f32
    %cst_9 = arith.constant 1.000000e+00 : f32
    %11 = arith.select %10, %cst_8, %cst_9 : f32
    %12 = vector.broadcast %11 : f32 to vector<4x128xf32>
    %13 = arith.mulf %5, %12 : vector<4x128xf32>
    %14 = tpu.concatenate %9, %1, %13 in 0 : vector<4x128xf32>, vector<8x128xf32>, vector<4x128xf32> -> vector<16x128xf32>
    %c0_10 = arith.constant 0 : index
    %c0_11 = arith.constant 0 : index
    %15 = vector.load %arg5[%c0_10, %c0_11] : memref<5x128xf32, #tpu.memory_space<vmem>>, vector<5x128xf32>
    %c0_12 = arith.constant 0 : index
    %c0_13 = arith.constant 0 : index
    %16 = vector.load %arg6[%c0_12, %c0_13] : memref<1x128xf32, #tpu.memory_space<vmem>>, vector<1x128xf32>
    %17 = vector.extract_strided_slice %14 {offsets = [0, 0], sizes = [12, 128], strides = [1, 1]} : vector<16x128xf32> to vector<12x128xf32>
    %18 = vector.extract_strided_slice %15 {offsets = [0, 0], sizes = [1, 128], strides = [1, 1]} : vector<5x128xf32> to vector<1x128xf32>
    %19 = vector.broadcast %18 : vector<1x128xf32> to vector<12x128xf32>
    %20 = arith.mulf %17, %19 : vector<12x128xf32>
    %21 = vector.broadcast %16 : vector<1x128xf32> to vector<12x128xf32>
    %22 = arith.addf %20, %21 : vector<12x128xf32>
    %23 = vector.extract_strided_slice %14 {offsets = [1, 0], sizes = [12, 128], strides = [1, 1]} : vector<16x128xf32> to vector<12x128xf32>
    %24 = vector.extract_strided_slice %15 {offsets = [1, 0], sizes = [1, 128], strides = [1, 1]} : vector<5x128xf32> to vector<1x128xf32>
    %25 = vector.broadcast %24 : vector<1x128xf32> to vector<12x128xf32>
    %26 = arith.mulf %23, %25 : vector<12x128xf32>
    %27 = arith.addf %22, %26 : vector<12x128xf32>
    %28 = vector.extract_strided_slice %14 {offsets = [2, 0], sizes = [12, 128], strides = [1, 1]} : vector<16x128xf32> to vector<12x128xf32>
    %29 = vector.extract_strided_slice %15 {offsets = [2, 0], sizes = [1, 128], strides = [1, 1]} : vector<5x128xf32> to vector<1x128xf32>
    %30 = vector.broadcast %29 : vector<1x128xf32> to vector<12x128xf32>
    %31 = arith.mulf %28, %30 : vector<12x128xf32>
    %32 = arith.addf %27, %31 : vector<12x128xf32>
    %33 = vector.extract_strided_slice %14 {offsets = [3, 0], sizes = [12, 128], strides = [1, 1]} : vector<16x128xf32> to vector<12x128xf32>
    %34 = vector.extract_strided_slice %15 {offsets = [3, 0], sizes = [1, 128], strides = [1, 1]} : vector<5x128xf32> to vector<1x128xf32>
    %35 = vector.broadcast %34 : vector<1x128xf32> to vector<12x128xf32>
    %36 = arith.mulf %33, %35 : vector<12x128xf32>
    %37 = arith.addf %32, %36 : vector<12x128xf32>
    %38 = vector.extract_strided_slice %14 {offsets = [4, 0], sizes = [12, 128], strides = [1, 1]} : vector<16x128xf32> to vector<12x128xf32>
    %39 = vector.extract_strided_slice %15 {offsets = [4, 0], sizes = [1, 128], strides = [1, 1]} : vector<5x128xf32> to vector<1x128xf32>
    %40 = vector.broadcast %39 : vector<1x128xf32> to vector<12x128xf32>
    %41 = arith.mulf %38, %40 : vector<12x128xf32>
    %42 = arith.addf %37, %41 : vector<12x128xf32>
    %cst_14 = arith.constant 5.000000e-01 : f32
    %43 = vector.broadcast %cst_14 : f32 to vector<12x128xf32>
    %44 = arith.mulf %43, %42 : vector<12x128xf32>
    %cst_15 = arith.constant 0.707106769 : f32
    %45 = vector.broadcast %cst_15 : f32 to vector<12x128xf32>
    %46 = arith.mulf %42, %45 : vector<12x128xf32>
    %47 = math.erf %46 : vector<12x128xf32>
    %cst_16 = arith.constant 1.000000e+00 : f32
    %48 = vector.broadcast %cst_16 : f32 to vector<12x128xf32>
    %49 = arith.addf %48, %47 : vector<12x128xf32>
    %50 = arith.mulf %44, %49 : vector<12x128xf32>
    %51 = vector.extract_strided_slice %50 {offsets = [2, 0], sizes = [8, 128], strides = [1, 1]} : vector<12x128xf32> to vector<8x128xf32>
    %cst_17 = arith.constant dense<0.000000e+00> : vector<128xf32>
    %52 = vector.multi_reduction <add>, %51, %cst_17 [0] : vector<8x128xf32> to vector<128xf32>
    %53 = vector.shape_cast %52 : vector<128xf32> to vector<1x128xf32>
    %c0_18 = arith.constant 0 : index
    %c0_19 = arith.constant 0 : index
    %c0_20 = arith.constant 0 : index
    %c0_21 = arith.constant 0 : index
    %54 = vector.load %arg7[%c0_18, %c0_19, %c0_20, %c0_21] : memref<1x1x1x128xf32, #tpu.memory_space<vmem>>, vector<1x1x1x128xf32>
    %55 = vector.shape_cast %54 : vector<1x1x1x128xf32> to vector<1x128xf32>
    %56 = vector.shape_cast %53 : vector<1x128xf32> to vector<1x1x1x128xf32>
    tpu.vector_store %arg7[%c0_18, %c0_19, %c0_20, %c0_21], %56 {strides = array<i32>} : memref<1x1x1x128xf32, #tpu.memory_space<vmem>>, vector<1x1x1x128xf32>,
    %57 = arith.mulf %51, %51 : vector<8x128xf32>
    %cst_22 = arith.constant dense<0.000000e+00> : vector<128xf32>
    %58 = vector.multi_reduction <add>, %57, %cst_22 [0] : vector<8x128xf32> to vector<128xf32>
    %59 = vector.shape_cast %58 : vector<128xf32> to vector<1x128xf32>
    %c0_23 = arith.constant 0 : index
    %c0_24 = arith.constant 0 : index
    %c0_25 = arith.constant 0 : index
    %c0_26 = arith.constant 0 : index
    %60 = vector.load %arg8[%c0_23, %c0_24, %c0_25, %c0_26] : memref<1x1x1x128xf32, #tpu.memory_space<vmem>>, vector<1x1x1x128xf32>
    %61 = vector.shape_cast %60 : vector<1x1x1x128xf32> to vector<1x128xf32>
    %62 = vector.shape_cast %59 : vector<1x128xf32> to vector<1x1x1x128xf32>
    tpu.vector_store %arg8[%c0_23, %c0_24, %c0_25, %c0_26], %62 {strides = array<i32>} : memref<1x1x1x128xf32, #tpu.memory_space<vmem>>, vector<1x1x1x128xf32>,
    return
  }
  func.func @transform_0(%arg0: i32, %arg1: i32) -> (i32, i32, i32) {
    %c0_i32 = arith.constant 0 : i32
    %c0_i32_0 = arith.constant 0 : i32
    return %arg0, %arg1, %c0_i32 : i32, i32, i32
  }
  func.func @transform_1(%arg0: i32, %arg1: i32) -> (i32, i32, i32) {
    %c1_i32 = arith.constant 1 : i32
    %0 = arith.muli %arg1, %c1_i32 : i32
    %c1_i32_0 = arith.constant 1 : i32
    %1 = arith.subi %0, %c1_i32_0 : i32
    %c0_i32 = arith.constant 0 : i32
    %2 = arith.maxsi %1, %c0_i32 : i32
    %c0_i32_1 = arith.constant 0 : i32
    %c0_i32_2 = arith.constant 0 : i32
    return %arg0, %2, %c0_i32_1 : i32, i32, i32
  }
  func.func @transform_2(%arg0: i32, %arg1: i32) -> (i32, i32, i32) {
    %c1_i32 = arith.constant 1 : i32
    %0 = arith.addi %arg1, %c1_i32 : i32
    %c1_i32_0 = arith.constant 1 : i32
    %1 = arith.muli %0, %c1_i32_0 : i32
    %c1_i32_1 = arith.constant 1 : i32
    %2 = arith.minsi %1, %c1_i32_1 : i32
    %c0_i32 = arith.constant 0 : i32
    %c0_i32_2 = arith.constant 0 : i32
    return %arg0, %2, %c0_i32 : i32, i32, i32
  }
  func.func @transform_3(%arg0: i32, %arg1: i32) -> (i32, i32) {
    %c0_i32 = arith.constant 0 : i32
    %c0_i32_0 = arith.constant 0 : i32
    %c0_i32_1 = arith.constant 0 : i32
    return %c0_i32, %c0_i32_0 : i32, i32
  }
  func.func @transform_4(%arg0: i32, %arg1: i32) -> (i32, i32) {
    %c0_i32 = arith.constant 0 : i32
    %c0_i32_0 = arith.constant 0 : i32
    %c0_i32_1 = arith.constant 0 : i32
    return %c0_i32, %c0_i32_0 : i32, i32
  }
  func.func @transform_5(%arg0: i32, %arg1: i32) -> (i32, i32, i32, i32) {
    %c0_i32 = arith.constant 0 : i32
    %c0_i32_0 = arith.constant 0 : i32
    %c0_i32_1 = arith.constant 0 : i32
    return %arg0, %arg1, %c0_i32, %c0_i32_0 : i32, i32, i32, i32
  }
  func.func @transform_6(%arg0: i32, %arg1: i32) -> (i32, i32, i32, i32) {
    %c0_i32 = arith.constant 0 : i32
    %c0_i32_0 = arith.constant 0 : i32
    %c0_i32_1 = arith.constant 0 : i32
    return %arg0, %arg1, %c0_i32, %c0_i32_0 : i32, i32, i32, i32
  }
}

</mosaic_0001>

<bundles_post_ra>
// kernel: tpu_custom_call.1
= control target key start
LH: loop header
LB: loop body
LE: loop exit
PB: predicated region body
PF: predicated region fallthrough
CT: control target
= control target key end

     0   :  { %s1738_s0 = inlined_call_operand.hbm [shape: f32[2,16,128], index: 0, kind: input, shape index: {}]   ;;  %s1739_s1 = inlined_call_operand.hbm [shape: f32[2,16,128], index: 1, kind: input, shape index: {}]   ;;  %s1740_s2 = inlined_call_operand.hbm [shape: f32[2,16,128], index: 2, kind: input, shape index: {}]   ;;  %s1741_s3 = inlined_call_operand.hbm [shape: f32[5,128], index: 3, kind: input, shape index: {}]   ;;  %s1742_s4 = inlined_call_operand.vmem [shape: f32[1,128], index: 4, kind: input, shape index: {}]   ;;  %s1743_s5 = inlined_call_operand.hbm [shape: f32[2,2,1,128], index: 5, kind: output, shape index: {0}]   ;;  %s1744_s6 = inlined_call_operand.hbm [shape: f32[2,2,1,128], index: 6, kind: output, shape index: {1}]  }
   0x1   :  { %1757 = sst [smem:[#allocation28_spill]] %s1738_s0 }
   0x2   :  { %1758 = sst [smem:[#allocation29_spill]] %s1739_s1 }
   0x3   :  { %1759 = sst [smem:[#allocation30_spill]] %s1740_s2 }
   0x4   :  { %1760 = sst [smem:[#allocation31_spill]] %s1741_s3 }
   0x5   :  { %1761 = sst [smem:[#allocation32_spill]] %s1742_s4 }
   0x6   :  { %1762 = sst [smem:[#allocation33_spill]] %s1743_s5 }
   0x7   :  { %1763 = sst [smem:[#allocation34_spill]] %s1744_s6 }
   0x8   :  { %12 = vsyncpa [#allocation3], 0 }
   0x9   :  { %14 = vsyncpa [#allocation3 + $0x1], 0 }
   0xa   :  { %15 = vsyncpa [#allocation6], 0 }
   0xb   :  { %17 = vsyncpa [#allocation6 + $0x1], 0 }
   0xc   :  { %18 = vsyncpa [#allocation9], 0 }
   0xd   :  { %19 = vsyncpa [#allocation4], 0 }
   0xe   :  { %21 = vsyncpa [#allocation4 + $0x1], 0 }
   0xf   :  { %22 = vsyncpa [#allocation12], 0 }
  0x10   :  { %24 = vsyncpa [#allocation12 + $0x1], 0  ;;  %s1356_s21 = smov 0   ;;  %s1358_s22 = smov 0  }
  0x11   :  { %s1360_s23 = smov 0   ;;  %s1362_s24 = smov 0  }
  0x12   :  { %s1364_s25 = smov 0   ;;  %s1366_s26 = smov 0  }
  0x13   :  { %s1368_s27 = smov 0   ;;  %s1370_s28 = smov 0  }
  0x14   :  { %s1372_s29 = smov 0   ;;  %s1374_s30 = smov 0  }
  0x15   :  { %s1376_s7 = smov 0   ;;  %s1378_s8 = smov 0  }
  0x16   :  { %s1380_s9 = smov 0   ;;  %s1382_s10 = smov 0  }
  0x17 LB: > { %1764 = sst [smem:[#allocation19_spill]] %s1286_s26  ;;  %s39_s11 = sadd.s32 1, %s1310_s8  ;;  %s1318_s10 = sphi %s1382_s10, %s30_s10   ;;  %s1314_s9 = sphi %s1380_s9, %s1815_s9   ;;  %s1310_s8 = sphi %s1378_s8, %s1804_s8   ;;  %s1306_s7 = sphi %s1376_s7, %s1814_s7   ;;  %s1302_s30 = sphi %s1374_s30, %s1813_s30   ;;  %s1298_s29 = sphi %s1372_s29, %s1802_s29   ;;  %s1294_s28 = sphi %s1370_s28, %s1812_s28   ;;  %s1290_s27 = sphi %s1368_s27, %s1811_s27   ;;  %s1286_s26 = sphi %s1366_s26, %s1800_s26   ;;  %s1282_s25 = sphi %s1364_s25, %s1810_s25   ;;  %s1278_s24 = sphi %s1362_s24, %s1809_s24   ;;  %s1274_s23 = sphi %s1360_s23, %s1808_s23   ;;  %s1270_s22 = sphi %s1358_s22, %s1807_s22   ;;  %s1266_s21 = sphi %s1356_s21, %s1806_s21  }
  0x18   : > { %1765 = sst [smem:[#allocation20_spill]] %s1298_s29  ;;  %s42_s12 = sadd.s32 1, %s1314_s9 }
  0x19   : > { %1766 = sst [smem:[#allocation21_spill]] %s1302_s30  ;;  %p40_p0 = scmp.ge.s32.totalorder %s39_s11, 2 }
  0x1a   : > { %1767 = sst [smem:[#allocation22_spill]] %s1306_s7  ;;  %p59_p1 = scmp.eq.s32.totalorder %s1318_s10, 0 }
  0x1b   : > { %1768 = sst [smem:[#allocation23_spill]] %s1310_s8  ;;  %s85_s13 = sadd.s32 1, %s1286_s26 }
  0x1c   : > { %s1817_s11 = smov (%p40_p0, %s39_s11), 0  ;;  %s1819_s12 = smov (!%p40_p0, %s42_s12), %s1314_s9 }
  0x1d   : > { %1769 = sst [smem:[#allocation24_spill]] %s1817_s11  ;;  %s47_s14 = ssub.s32 %s1310_s8, %s1817_s11 }
  0x1e   : > { %p44_p2 = scmp.ge.s32.totalorder %s1819_s12, 2  ;;  %p92_p3 = scmp.ne.s32.totalorder %s1286_s26, %s1282_s25 }
  0x1f   : > { %p98_p4 = scmp.ne.s32.totalorder %s1282_s25, %s1278_s24  ;;  %p883_p7 = scmp.lt.s32.totalorder %s1318_s10, 4 }
  0x20   : > { %s1821_s12 = smov (%p44_p2, %s1819_s12), 0  ;;  %p1450_p5 = por %p92_p3, %p59_p1 }
  0x21   : > { %1770 = sst [smem:[#allocation25_spill]] %s1821_s12  ;;  %s1441_s15 = ssub.s32 %s1314_s9, %s1821_s12 }
  0x22   : > { %s1446_s16 = sor.u32 %s47_s14, %s1441_s15  ;;  %s290_s19 = sand.u32 1, %s1318_s10  }
  0x23   : > { %p49_p6 = scmp.eq.s32.totalorder %s1446_s16, 0  ;;  %p1751_p8 = scmp.eq.s32.totalorder %s1441_s15, 0 }
  0x24   : > { %s292_s20 = sand.u32 1, %s1286_s26   ;;  %s1752_s14 = sshll.u32 %s1314_s9, 4 }
  0x25   : > { %s829_s12 = sshll.u32 %s292_s20, 3  ;;  %s1773_s1 = sld [smem:[#allocation29_spill]] }
  0x26   : > { %s1463_s11 = scalar_select %p1751_p8, %s1286_s26, %s85_s13  }
  0x27   : > { %s294_s4 = scalar_lea.vmem [#allocation5], %s829_s12  ;;  %p869_p9 = pnand %p883_p7, %p1450_p5 }
  0x28   : > { %1772 = sst [smem:[#allocation26_spill]] %s1463_s11  ;;  %s307_s30 = sshll.u32 %s294_s4, 4  ;;  %s308_s30 = int_to_ptr.vmem [resolvable:$true] %s307_s30 }
  0x29   : > { %s1475_s18 = scalar_lea.sflag [#allocation6], %s290_s19  ;;  %p1008_p11 = pneg %p869_p9 }
  0x2b   : > { %s303_s7 = scalar_lea.hbm %s1773_s1, %s1752_s14 }
  0x2c   : > { %s305_s2 = sshll.u32 %s303_s7, 4  ;;  %s306_s2 = int_to_ptr.hbm [resolvable:$true] %s305_s2 }
  0x2d   : > { %s1004_s20 = sshra.s32 %s306_s2, 4  ;;  %s1005_s20 = int_to_ptr.hbm [resolvable:$true] %s1004_s20 }
  0x2e   : > { %s1006_s13 = scalar_lea.hbm %s1005_s20, 8  ;;  %p1012_p0 = scmp.lt.s32.totalorder %s1005_s20, %s1773_s1 }
  0x2f   : > { %p1007_p10 = scmp.ne.s32.totalorder %s1005_s20, %s1006_s13 }
  0x31   : > { %p1009_p12 = pnand %p1008_p11, %p1007_p10 }
  0x33   : > { %p1010_p13 = pneg %p1009_p12 }
  0x35   : > { %p1015_p2 = pnand %p1012_p0, %p1010_p13 }
  0x37   : > { %1018 = shalt.err (!%p1015_p2)
}
  0x38   : > { %871 = dma.hbm_to_vmem [thread:$0]  (!%p869_p9), %s306_s2, 128, %s308_s30, %s1475_s18  }
  0x39   : > { %s1482_s4 = sadd.s32 4294967295, %s1318_s10   ;;  %p823_p5 = scmp.ge.s32.totalorder %s1318_s10, 1 }
  0x3a   : > { %p1756_p3 = scmp.eq.s32.totalorder %s1482_s4, 0  ;;  %p241_p10 = scmp.lt.s32.totalorder %s1318_s10, 5 }
  0x3b   : > { %s1775_s3 = sld [smem:[#allocation31_spill]]  ;;  %s1320_s24 = smov [#allocation8]  }
  0x3c   : > { %p1492_p11 = por %p98_p4, %p1756_p3  ;;  %p1499_p9 = pnand %p823_p5, %p241_p10 }
  0x3d   : > { %s255_s12 = sshll.u32 %s1320_s24, 4  ;;  %s820_s17 = sadd.s32 4294967294, %s1318_s10   ;;  %s256_s12 = int_to_ptr.vmem [resolvable:$true] %s255_s12 }
  0x3e   : > { %p861_p12 = pneg %p1499_p9  ;;  %s51_s19 = sadd.s32 1, %s1298_s29 }
  0x3f   : > { %s1512_s20 = scalar_select %p49_p6, %s1298_s29, %s51_s19  }
  0x40   : > { %p862_p4 = pnand %p861_p12, %p1756_p3  ;;  %p58_p13 = scmp.ne.s32.totalorder %s1298_s29, %s1294_s28 }
  0x41   : > { %s253_s7 = sshll.u32 %s1775_s3, 4  ;;  %1777 = sst [smem:[#allocation27_spill]] %s1512_s20  ;;  %s254_s7 = int_to_ptr.hbm [resolvable:$true] %s253_s7 }
  0x42   : > { %864 = dma.hbm_to_vmem [thread:$0]  (!%p862_p4), %s254_s7, 128, %s256_s12, [#allocation9]  }
  0x43   : > { %p64_p0 = scmp.ne.s32.totalorder %s1294_s28, %s1290_s27  ;;  %p200_p2 = scmp.eq.s32.totalorder %s1482_s4, 3 }
  0x44   : > { %p206_p5 = scmp.eq.s32.totalorder %s820_s17, 3  ;;  %p1521_p10 = por %p59_p1, %p58_p13 }
  0x45   : > { %p1527_p8 = por %p1756_p3, %p64_p0  ;;  %p1531_p12 = por %p200_p2, %p58_p13 }
  0x46   : > { %p1535_p6 = por %p206_p5, %p64_p0  ;;  %s269_s30 = sand.u32 1, %s1298_s29  }
  0x47   : > { %s1782_s7 = sshll.u32 %s1314_s9, 1  ;;  %s826_s12 = sshll.u32 %s269_s30, 3 }
  0x48   : > { %s1781_s6 = scalar_select %p1535_p6, 1, 0 }
  0x49   : > { %s277_s24 = sadd.s32 %s1310_s8, %s1782_s7  ;;  %s1783_s0 = sld [smem:[#allocation28_spill]] }
  0x4a   : > { %s828_s17 = sshll.u32 %s277_s24, 3  ;;  %s273_s3 = scalar_lea.vmem [#allocation2], %s826_s12 }
  0x4b   : > { %s283_s20 = sshll.u32 %s273_s3, 4  ;;  %p866_p4 = pnand %p883_p7, %p1521_p10  ;;  %s284_s20 = int_to_ptr.vmem [resolvable:$true] %s283_s20 }
  0x4c   : > { %s270_s7 = scalar_lea.sflag [#allocation3], %s269_s30  ;;  %s119_s8 = sadd.s32 1, %s1274_s23 }
  0x4d   : > { %p126_p13 = scmp.ne.s32.totalorder %s1274_s23, %s1270_s22  ;;  %p132_p0 = scmp.ne.s32.totalorder %s1270_s22, %s1266_s21 }
  0x4e   : > { %s316_s24 = sand.u32 1, %s1274_s23   ;;  %s1785_s14 = sshll.u32 %s1314_s9, 4 }
  0x4f   : > { %s279_s1 = scalar_lea.hbm %s1783_s0, %s828_s17  ;;  %p128_p2 = por %p126_p13, %p59_p1 }
  0x50   : > { %s281_s26 = sshll.u32 %s279_s1, 4  ;;  %p1560_p5 = por %p132_p0, %p1756_p3  ;;  %s282_s26 = int_to_ptr.hbm [resolvable:$true] %s281_s26 }
  0x51   : > { %868 = dma.hbm_to_vmem [thread:$0]  (!%p866_p4), %s282_s26, 128, %s284_s20, %s270_s7  }
  0x52   : > { %s833_s1 = sshll.u32 %s316_s24, 3  ;;  %s1262_s12 = sadd.s32 8, %s1785_s14 }
  0x53   : > { %s318_s13 = scalar_lea.vmem [#allocation7], %s833_s1  ;;  %p1786_p10 = scmp.eq.s32.totalorder %s1441_s15, 0 }
  0x54   : > { %s331_s17 = sshll.u32 %s318_s13, 4  ;;  %s1787_s19 = sld [smem:[#allocation30_spill]]  ;;  %s332_s17 = int_to_ptr.vmem [resolvable:$true] %s331_s17 }
  0x55   : > { %s1569_s30 = scalar_select %p1786_p10, %s1274_s23, %s119_s8  }
  0x56   : > { %p872_p1 = pnand %p883_p7, %p128_p2 }
  0x58   : > { %p1098_p13 = pneg %p872_p1 }
  0x5a   : > { %s327_s21 = scalar_lea.hbm %s1787_s19, %s1262_s12  ;;  %s1101_s8 = scalar_lea.hbm %s1787_s19, 32 }
  0x5b   : > { %s329_s7 = sshll.u32 %s327_s21, 4  ;;  %s330_s7 = int_to_ptr.hbm [resolvable:$true] %s329_s7 }
  0x5c   : > { %s1094_s0 = sshra.s32 %s330_s7, 4  ;;  %s1095_s0 = int_to_ptr.hbm [resolvable:$true] %s1094_s0 }
  0x5d   : > { %s1096_s29 = scalar_lea.hbm %s1095_s0, 8 }
  0x5e   : > { %p1097_p4 = scmp.ne.s32.totalorder %s1095_s0, %s1096_s29  ;;  %p1103_p10 = scmp.lt.s32.totalorder %s1101_s8, %s1096_s29 }
  0x60   : > { %p1099_p0 = pnand %p1098_p13, %p1097_p4 }
  0x62   : > { %p1100_p3 = pneg %p1099_p0 }
  0x64   : > { %p1105_p6 = pnand %p1103_p10, %p1100_p3 }
  0x66   : > { %1108 = shalt.err (!%p1105_p6)
}
  0x67   : > { %874 = dma.hbm_to_vmem [thread:$0]  (!%p872_p1), %s330_s7, 128, %s332_s17, %s1475_s18  }
  0x68   : > { %340 = sbr.rel (%p1499_p9) target bundleno = 232 (0xe8), region = 40  ;;  %s1583_s1 = sand.u32 (!%p1499_p9), 1, %s1294_s28  }
  0x69   : > { %s837_s0 = sshll.u32 (!%p1499_p9), %s1583_s1, 3  ;;  %s343_s14 = scalar_lea.sflag (!%p1499_p9), [#allocation3], %s1583_s1 }
  0x6a   : > { %s346_s12 = scalar_lea.vmem (!%p1499_p9), [#allocation2], %s837_s0 }
  0x6d   : > { %1237 = dma.done.wait (%p1527_p8), %s343_s14, 128  }
  0x6e   : > { %1239 = vsyncadd (%p1527_p8), %s343_s14, 4294967168  ;;  %s352_s29 = sand.u32 1, %s1482_s4   ;;  %s354_s18 = sand.u32 1, %s1282_s25  }
  0x6f   : > { %s838_s11 = sshll.u32 %s354_s18, 3  ;;  %s353_s13 = scalar_lea.sflag [#allocation6], %s352_s29 }
  0x70   : > { %s356_s17 = scalar_lea.vmem [#allocation5], %s838_s11 }
  0x71   : > { %1241 = dma.done.wait (%p1492_p11), %s353_s13, 128  }
  0x72   : > { %1243 = vsyncadd (%p1492_p11), %s353_s13, 4294967168  ;;  %s364_s26 = sand.u32 1, %s1270_s22  }
  0x73   : > { %s839_s20 = sshll.u32 %s364_s26, 3 }
  0x74   : > { %s366_s21 = scalar_lea.vmem [#allocation7], %s839_s20 }
  0x75   : > { %1245 = dma.done.wait (%p1560_p5), %s353_s13, 128  }
  0x76   : > { %1247 = vsyncadd (%p1560_p5), %s353_s13, 4294967168  ;;  %p1788_p7 = scmp.eq.s32.totalorder %s1482_s4, 0 }
  0x78   : > { %1249 = dma.done.wait (%p1788_p7), [#allocation9], 128   ;;  %p1789_p8 = pmov %p1788_p7 }
  0x79   : > { %s1790_s5 = sld [smem:[#allocation21_spill]]  ;;  %v420_v2 = vld [vmem:[%s346_s12] sm:$0xff]  ;;  %v421_v3 = vld [vmem:[%s356_s17 + $0x4] sm:$0xf]  ;;  %vm437_vm0 = vcmask 1043456   ;;  %vm455_vm1 = vcmask 1046528  }
  0x7a   : > { %1251 = vsyncadd (%p1789_p8), [#allocation9], 4294967168  ;;  %v422_v4 = vld [vmem:[%s366_s21] sm:$0xf]  ;;  %v432_v7 = vrot.slane %v420_v2, 4  ;;  %s1791_s24 = sld [smem:[#allocation32_spill]] }
  0x7b   : > { %v440_v8 = vld [vmem:[#allocation8] sm:$0x1f]  ;;  %vm468_vm2 = vcmask 1045504   ;;  %vm481_vm3 = vcmask 1044480   ;;  %s1792_s15 = sld [smem:[#allocation22_spill]]  ;;  %s407_s13 = scalar_lea.vmem [#allocation10], %s1583_s1 }
  0x7c   : > { %v442_v9 = vperm.slane %v440_v8, 0  ;;  %v450_v10 = vperm.slane %v440_v8, 1  ;;  %v463_v11 = vperm.slane %v440_v8, 2  ;;  %v476_v12 = vperm.slane %v440_v8, 3  ;;  %s1793_s29 = sld [smem:[#allocation33_spill]]  ;;  %s1642_s17 = sshll.u32 %s407_s13, 4  ;;  %s635_s17 = int_to_ptr.vmem [resolvable:$true] %s1642_s17 }
  0x7d   : > { %v489_v16 = vperm.slane %v440_v8, 4  ;;  %s1795_s21 = sld [smem:[#allocation34_spill]]  ;;  %s413_s4 = scalar_lea.vmem [#allocation11], %s1583_s1 }
  0x7e   : > { %s1650_s3 = sshll.u32 %s413_s4, 4  ;;  %s650_s3 = int_to_ptr.vmem [resolvable:$true] %s1650_s3 }
  0x7f   : > { %p423_p3 = scmp.eq.s32.totalorder %s1790_s5, 0  ;;  %p427_p11 = scmp.eq.s32.totalorder %s1790_s5, 1 }
  0x80   : > { %v999_v15 = vld [vmem:[%s1791_s24] ss:$0 sm:$0xff] }
  0x81   : > { %s424_s2 = scalar_select %p423_p3, 0.0, 1.0 }
  0x82   : > { %s428_s7 = scalar_select %p427_p11, 0.0, 1.0 }
  0x83   : > { %v425_v0 = vstv %s424_s2  ;;  %s843_s8 = sshll.u32 %s1792_s15, 1  ;;  %s1794_s18 = smov %s1793_s29 }
  0x84   : > { %v429_v1 = vstv %s428_s7  ;;  %v426_v5 = vmul.f32 %v425_v0, %v421_v3  ;;  %s631_s0 = sadd.s32 %s1790_s5, %s843_s8  ;;  %s1796_s2 = smov %s1795_s21 }
  0x85   : > { %v430_v6 = vmul.f32 %v429_v1, %v422_v4  ;;  %s632_s11 = scalar_lea.hbm %s1793_s29, %s631_s0  ;;  %s647_s7 = scalar_lea.hbm %s1795_s21, %s631_s0 }
  0x86   : > { %v438_v14 = vsel %vm437_vm0, %v426_v5, %v432_v7  ;;  %s1647_s5 = sshll.u32 %s632_s11, 4  ;;  %s1653_s24 = sshll.u32 %s647_s7, 4  ;;  %s637_s5 = int_to_ptr.hbm [resolvable:$true] %s1647_s5  ;;  %s652_s24 = int_to_ptr.hbm [resolvable:$true] %s1653_s24 }
  0x87   : > { %v435_v13 = vrot.slane %v430_v6, 4  ;;  %v443_v17 = vmul.f32 %v442_v9, %v438_v14  ;;  %v451_v18 = vmul.f32 %v450_v10, %v438_v14  ;;  %v464_v19 = vmul.f32 %v463_v11, %v438_v14  ;;  %s618_s15 = scalar_lea.sflag [#allocation4], %s1583_s1  ;;  %s1138_s8 = sshra.s32 %s637_s5, 4  ;;  %s1139_s8 = int_to_ptr.hbm [resolvable:$true] %s1138_s8 }
  0x88   : > { %v477_v20 = vmul.f32 %v476_v12, %v438_v14  ;;  %v490_v25 = vmul.f32 %v489_v16, %v438_v14  ;;  %s1140_s0 = scalar_lea.hbm %s1139_s8, 1  ;;  %s1144_s29 = scalar_lea.hbm %s1794_s18, 4 }
  0x89   : > { %v439_v21 = vsel %vm437_vm0, %v432_v7, %v435_v13  ;;  %v456_v24 = vrot.slane %v451_v18, 1  ;;  %v448_v26 = vadd.f32 %v999_v15, %v443_v17  ;;  %v469_v28 = vrot.slane %v464_v19, 2  ;;  %p1141_p9 = scmp.ne.s32.totalorder %s1139_s8, %s1140_s0  ;;  %p1145_p5 = scmp.lt.s32.totalorder %s1139_s8, %s1794_s18 }
  0x8a   : > { %v444_v22 = vmul.f32 %v442_v9, %v439_v21  ;;  %v452_v23 = vmul.f32 %v450_v10, %v439_v21  ;;  %v465_v27 = vmul.f32 %v463_v11, %v439_v21  ;;  %v478_v29 = vmul.f32 %v476_v12, %v439_v21  ;;  %p1146_p1 = scmp.lt.s32.totalorder %s1144_s29, %s1140_s0 }
  0x8b   : > { %v482_v32 = vrot.slane %v477_v20, 3  ;;  %v491_v33 = vmul.f32 %v489_v16, %v439_v21  ;;  %v494_v38 = vrot.slane %v490_v25, 4  ;;  %p1142_p6 = pnand %p1141_p9, %p1531_p12 }
  0x8c   : > { %v449_v30 = vadd.f32 %v999_v15, %v444_v22  ;;  %v457_v31 = vrot.slane %v452_v23, 1  ;;  %v470_v34 = vrot.slane %v465_v27, 2  ;;  %v483_v35 = vrot.slane %v478_v29, 3  ;;  %p1147_p4 = por %p1146_p1, %p1145_p5 }
  0x8d   : > { %v495_v39 = vrot.slane %v491_v33, 4  ;;  %p1143_p2 = pneg %p1142_p6 }
  0x8e   : > { %v458_v36 = vsel %vm455_vm1, %v456_v24, %v457_v31  ;;  %v462_v37 = vadd.f32 %v457_v31, %v449_v30  ;;  %v471_v41 = vsel %vm468_vm2, %v469_v28, %v470_v34  ;;  %v484_v43 = vsel %vm481_vm3, %v482_v32, %v483_v35 }
  0x8f   : > { %v461_v40 = vadd.f32 %v458_v36, %v448_v26  ;;  %v496_v46 = vsel %vm437_vm0, %v494_v38, %v495_v39  ;;  %p1148_p13 = pnand %p1147_p4, %p1143_p2 }
  0x90   : > { %v475_v42 = vadd.f32 %v470_v34, %v462_v37 }
  0x91   : > { %v474_v44 = vadd.f32 %v471_v41, %v461_v40 }
  0x92   : > { %v488_v45 = vadd.f32 %v483_v35, %v475_v42 }
  0x93   : > { %v487_v47 = vadd.f32 %v484_v43, %v474_v44 }
  0x94   : > { %v1616_v48 = vadd.f32 %v495_v39, %v488_v45 }
  0x95   : > { %v1618_v49 = vadd.f32 %v496_v46, %v487_v47 }
  0x96   : > { %v1621_v50 = vmul.f32 0.70710677, %v1616_v48 }
  0x97   : > { %v1624_v51 = vmul.f32 0.70710677, %v1618_v49 }
  0x98   : > { %v545_v52 = vmul.f32 %v1621_v50, %v1621_v50 }
  0x99   : > { %v505_v53 = vmul.f32 %v1624_v51, %v1624_v51 }
  0x9a   : > { %v546_v54 = vmin.f32 %v545_v52, 16.0 }
  0x9b   : > { %v506_v55 = vmin.f32 %v505_v53, 16.0 }
  0x9c   : > { %v547_v56 = vmul.f32 2.1237322e-06, %v546_v54  ;;  %v558_v57 = vmul.f32 3.8918573e-05, %v546_v54 }
  0x9d   : > { %v507_v58 = vmul.f32 2.1237322e-06, %v506_v55  ;;  %v518_v59 = vmul.f32 3.8918573e-05, %v506_v55 }
  0x9e   : > { %v548_v60 = vadd.f32 0.00028619796, %v547_v56  ;;  %v559_v61 = vadd.f32 0.001143296, %v558_v57 }
  0x9f   : > { %v508_v62 = vadd.f32 0.00028619796, %v507_v58  ;;  %v519_v63 = vadd.f32 0.001143296, %v518_v59 }
  0xa0   : > { %v549_v0 = vmul.f32 %v548_v60, %v546_v54  ;;  %v560_v1 = vmul.f32 %v559_v61, %v546_v54  ;;  %v502_v60 = vmul.f32 0.5, %v1616_v48 }
  0xa1   : > { %v509_v2 = vmul.f32 %v508_v62, %v506_v55  ;;  %v520_v3 = vmul.f32 %v519_v63, %v506_v55  ;;  %v501_v62 = vmul.f32 0.5, %v1618_v49 }
  0xa2   : > { %v550_v4 = vadd.f32 0.0036580483, %v549_v0  ;;  %v561_v5 = vadd.f32 0.014752088, %v560_v1 }
  0xa3   : > { %v510_v6 = vadd.f32 0.0036580483, %v509_v2  ;;  %v521_v7 = vadd.f32 0.014752088, %v520_v3 }
  0xa4   : > { %v551_v8 = vmul.f32 %v550_v4, %v546_v54  ;;  %v562_v9 = vmul.f32 %v561_v5, %v546_v54 }
  0xa5   : > { %v511_v10 = vmul.f32 %v510_v6, %v506_v55  ;;  %v522_v11 = vmul.f32 %v521_v7, %v506_v55 }
  0xa6   : > { %v563_v12 = vadd.f32 0.112945676, %v562_v9  ;;  %v552_v14 = vadd.f32 0.05243302, %v551_v8 }
  0xa7   : > { %v523_v13 = vadd.f32 0.112945676, %v522_v11  ;;  %v512_v15 = vadd.f32 0.05243302, %v511_v10 }
  0xa8   : > { %v564_v16 = vmul.f32 %v563_v12, %v546_v54  ;;  %v553_v20 = vmul.f32 %v552_v14, %v546_v54 }
  0xa9   : > { %v524_v17 = vmul.f32 %v523_v13, %v506_v55  ;;  %v513_v21 = vmul.f32 %v512_v15, %v506_v55 }
  0xaa   : > { %v565_v18 = vadd.f32 0.4994258, %v564_v16  ;;  %v554_v26 = vadd.f32 0.18741608, %v553_v20 }
  0xab   : > { %v525_v19 = vadd.f32 0.4994258, %v524_v17  ;;  %v514_v27 = vadd.f32 0.18741608, %v513_v21 }
  0xac   : > { %v566_v22 = vmul.f32 %v565_v18, %v546_v54  ;;  %v555_v28 = vmul.f32 %v554_v26, %v546_v54 }
  0xad   : > { %v526_v23 = vmul.f32 %v525_v19, %v506_v55  ;;  %v515_v29 = vmul.f32 %v514_v27, %v506_v55 }
  0xae   : > { %v567_v24 = vadd.f32 1.0, %v566_v22  ;;  %v556_v32 = vadd.f32 1.1283791, %v555_v28 }
  0xaf   : > { %v527_v25 = vadd.f32 1.0, %v526_v23  ;;  %v516_v34 = vadd.f32 1.1283791, %v515_v29 }
  0xb0   : > { %1000 = vrcp.f32 %v567_v24  ;;  %vm573_vm4 = vweird.f32 %v567_v24  ;;  %v579_v36 = vand.u32 2147483648, %v567_v24  ;;  %v577_v39 = vand.u32 2147483647, %v567_v24 }
  0xb1   : > { %1002 = vrcp.f32 %v527_v25  ;;  %v539_v37 = vand.u32 2147483648, %v527_v25  ;;  %vm533_vm6 = vweird.f32 %v527_v25  ;;  %v537_v41 = vand.u32 2147483647, %v527_v25 }
  0xb2   : > { %v580_v44 = vor.u32 1.1754944e-38, %v579_v36  ;;  %v557_v46 = vmul.f32 %v556_v32, %v1621_v50  ;;  %vm578_vm10 = vcmp.eq.f32.partialorder %v577_v39, 8.507059e+37  ;;  %v517_v52 = vmul.f32 %v516_v34, %v1624_v51 }
  0xb3   : > { %v540_v45 = vor.u32 1.1754944e-38, %v539_v37  ;;  %vm538_vm11 = vcmp.eq.f32.partialorder %v537_v41, 8.507059e+37 }
  0xb6   : > { %v1001_v30 = vpop.eup %1000 }
  0xb7   : > { %v1003_v31 = vpop.eup %1002  ;;  %v569_v33 = vmul.f32 %v1001_v30, %v567_v24  ;;  %vm574_vm5 = vweird.f32 %v1001_v30 }
  0xb8   : > { %v529_v35 = vmul.f32 %v1003_v31, %v527_v25  ;;  %vm534_vm7 = vweird.f32 %v1003_v31  ;;  %vm575_vm8 = vmor %vm573_vm4, %vm574_vm5 }
  0xb9   : > { %v570_v38 = vsub.f32 1.0, %v569_v33  ;;  %vm535_vm9 = vmor %vm533_vm6, %vm534_vm7 }
  0xba   : > { %v530_v40 = vsub.f32 1.0, %v529_v35 }
  0xbb   : > { %v571_v42 = vmul.f32 %v1001_v30, %v570_v38 }
  0xbc   : > { %v531_v43 = vmul.f32 %v1003_v31, %v530_v40 }
  0xbd   : > { %v572_v47 = vadd.f32 %v1001_v30, %v571_v42 }
  0xbe   : > { %v532_v53 = vadd.f32 %v1003_v31, %v531_v43 }
  0xbf   : > { %v576_v54 = vsel %vm575_vm8, %v1001_v30, %v572_v47 }
  0xc0   : > { %v536_v55 = vsel %vm535_vm9, %v1003_v31, %v532_v53  ;;  %v581_v56 = vsel %vm578_vm10, %v580_v44, %v576_v54 }
  0xc1   : > { %v541_v57 = vsel %vm538_vm11, %v540_v45, %v536_v55  ;;  %v582_v58 = vmul.f32 %v581_v56, %v557_v46 }
  0xc2   : > { %v542_v59 = vmul.f32 %v541_v57, %v517_v52 }
  0xc3   : > { %v842_v61 = vclamps-f32 %v582_v58, 1.0 }
  0xc4   : > { %v841_v50 = vclamps-f32 %v542_v59, 1.0 }
  0xc5   : > { %v586_v63 = vadd.f32 1.0, %v842_v61 }
  0xc6   : > { %v585_v0 = vadd.f32 1.0, %v841_v50 }
  0xc7   : > { %v588_v1 = vmul.f32 %v586_v63, %v502_v60 }
  0xc8   : > { %v587_v51 = vmul.f32 %v585_v0, %v501_v62 }
  0xc9   : > { %v592_v2 = vrot.slane %v588_v1, 2  ;;  %v603_v3 = vmul.f32 %v588_v1, %v588_v1 }
  0xca   : > { %v591_v4 = vrot.slane %v587_v51, 2  ;;  %v602_v5 = vmul.f32 %v587_v51, %v587_v51 }
  0xcb   : > { %v607_v6 = vrot.slane %v603_v3, 2 }
  0xcc   : > { %v593_v7 = vsel %vm468_vm2, %v591_v4, %v592_v2  ;;  %v606_v8 = vrot.slane %v602_v5, 2 }
  0xcd   : > { %v595_v48 = vrot.slane %v593_v7, 4 }
  0xce   : > { %v608_v49 = vsel %vm468_vm2, %v606_v8, %v607_v6 }
  0xcf   : > { %v596_v9 = vadd.f32 %v595_v48, %v593_v7  ;;  %v610_v10 = vrot.slane %v608_v49, 4 }
  0xd1   : > { %v597_v11 = vrot.slane %v596_v9, 2  ;;  %v611_v12 = vadd.f32 %v610_v10, %v608_v49 }
  0xd3   : > { %v598_v13 = vadd.f32 %v597_v11, %v596_v9  ;;  %v612_v14 = vrot.slane %v611_v12, 2 }
  0xd5   : > { %v599_v15 = vrot.slane %v598_v13, 1  ;;  %v613_v16 = vadd.f32 %v612_v14, %v611_v12 }
  0xd7   : > { %v600_v17 = vadd.f32 %v599_v15, %v598_v13  ;;  %v614_v18 = vrot.slane %v613_v16, 1 }
  0xd9   : > { %601 = vst [vmem:[%s407_s13] sm:$0x1] %v600_v17  ;;  %v615_v19 = vadd.f32 %v614_v18, %v613_v16 }
  0xda   : > { %1151 = shalt.err (!%p1148_p13)
}
  0xdb   : > { %857 = dma.vmem_to_hbm [thread:$0]  (%p1531_p12), %s635_s17, 16, %s637_s5, %s618_s15   ;;  %616 = vst [vmem:[%s413_s4] sm:$0x1] %v615_v19 }
  0xdc   : > { %s622_s13 = scalar_lea.sflag [#allocation12], %s1583_s1  ;;  %s1166_s20 = sshra.s32 %s652_s24, 4  ;;  %s1167_s20 = int_to_ptr.hbm [resolvable:$true] %s1166_s20 }
  0xdd   : > { %s1168_s21 = scalar_lea.hbm %s1167_s20, 1  ;;  %s1172_s0 = scalar_lea.hbm %s1796_s2, 4 }
  0xde   : > { %p1169_p0 = scmp.ne.s32.totalorder %s1167_s20, %s1168_s21  ;;  %p1173_p8 = scmp.lt.s32.totalorder %s1167_s20, %s1796_s2 }
  0xdf   : > { %p1174_p3 = scmp.lt.s32.totalorder %s1172_s0, %s1168_s21 }
  0xe0   : > { %p1170_p10 = pnand %p1169_p0, %p1531_p12 }
  0xe1   : > { %p1175_p11 = por %p1174_p3, %p1173_p8 }
  0xe2   : > { %p1171_p7 = pneg %p1170_p10 }
  0xe4   : > { %p1176_p9 = pnand %p1175_p11, %p1171_p7 }
  0xe6   : > { %1179 = shalt.err (!%p1176_p9)
}
  0xe7   : > { %858 = dma.vmem_to_hbm [thread:$0]  (%p1531_p12), %s650_s3, 16, %s652_s24, %s622_s13  }
  0xe8 PF: > { %p885_p6 = scmp.ge.s32.totalorder %s1318_s10, 2  ;;  %s663_s1 = sand.u32 1, %s1290_s27  }
  0xe9   : > { %p1797_p2 = scmp.ne.s32.totalorder %s1781_s6, 0  ;;  %s664_s17 = scalar_lea.sflag [#allocation4], %s663_s1 }
  0xeb   : > { %p876_p5 = pnand %p885_p6, %p1797_p2 }
  0xed   : > { %p877_p1 = pneg %p876_p5 }
  0xef   : > { %1253 = dma.done.wait (%p877_p1), %s664_s17, 16  }
  0xf0   : > { %1255 = vsyncadd (%p877_p1), %s664_s17, 4294967280  ;;  %s673_s5 = scalar_lea.sflag [#allocation12], %s663_s1 }
  0xf1   : > { %1257 = dma.done.wait (%p877_p1), %s673_s5, 16  }
  0xf2   : > { %1259 = vsyncadd (%p877_p1), %s673_s5, 4294967280  ;;  %s30_s10 = sadd.s32 1, %s1318_s10   ;;  %s1799_s27 = sld [smem:[#allocation19_spill]] }
  0xf3   : > { %p1691_p4 = scmp.ge.s32.totalorder %s30_s10, 6   ;;  %s1800_s26 = sld [smem:[#allocation26_spill]] }
  0xf4   : > { %s1801_s6 = sld [smem:[#allocation20_spill]]  ;;  %s1806_s21 = smov %s1270_s22 }
  0xf5   : > { %s1802_s29 = sld [smem:[#allocation27_spill]]  ;;  %s1807_s22 = smov %s1274_s23 }
  0xf6   : > { %s1803_s4 = sld [smem:[#allocation23_spill]]  ;;  %s1808_s23 = smov %s1569_s30 }
  0xf7   : > { %s1804_s8 = sld [smem:[#allocation24_spill]]  ;;  %s1809_s24 = smov %s1282_s25 }
  0xf8   : > { %s1805_s3 = sld [smem:[#allocation25_spill]]  ;;  %s1810_s25 = smov %s1799_s27 }
  0xf9   : > { %s1811_s27 = smov %s1294_s28  ;;  %s1814_s7 = smov %s1314_s9 }
  0xfa   : > { %s1812_s28 = smov %s1801_s6  ;;  %29 = sbr.rel (!%p1691_p4) target bundleno = 23 (0x17), region = 130 }
  0xfc   : > { %s1813_s30 = smov %s1803_s4 }
  0xfe   : > { %s1815_s9 = smov %s1805_s3 }
  0xff   :  { %678 = vsyncpa [#allocation3], 1 }
 0x100   :  { %680 = vsyncpa [#allocation3 + $0x1], 1 }
 0x101   :  { %681 = vsyncpa [#allocation6], 1 }
 0x102   :  { %683 = vsyncpa [#allocation6 + $0x1], 1 }
 0x103   :  { %684 = vsyncpa [#allocation9], 1 }
 0x104   :  { %685 = vsyncpa [#allocation4], 1 }
 0x105   :  { %687 = vsyncpa [#allocation4 + $0x1], 1 }
 0x106   :  { %688 = vsyncpa [#allocation12], 1 }
 0x107   :  { %690 = vsyncpa [#allocation12 + $0x1], 1 }

</bundles_post_ra>
